<compile_context>
chip_gen: v7x
topology: tpu7x:2x2x1
jax: 0.10.0
libtpu: 0.0.40
codegen_flags: <defaults>
</compile_context>

<pallas_src>
import functools

import jax
import jax.numpy as jnp
from jax.experimental import pallas as pl
from jax.experimental.pallas import tpu as pltpu

_EPS = 1e-8
_LANE = 128


def _vmem_capacity_bytes():
    try:
        return int(pltpu.get_tpu_info().vmem_capacity_bytes)
    except Exception:
        return 64 << 20  # conservative (v7x-sized) fallback


def _fused_limits():
    """(fused_max_elems, vmem_limit_bytes), generation aware."""
    cap = _vmem_capacity_bytes()
    if cap >= (96 << 20):            # v5e / v6e: 128 MiB physical VMEM
        return 3 * 1024 * 1024, 96 << 20
    return 1 * 1024 * 1024, 48 << 20  # v7x: 64 MiB physical VMEM


# ---------------------------------------------------------------------------
# Fused single-block path: whole (VMEM-resident) array in one kernel body.
# ---------------------------------------------------------------------------
def _fused_kernel(x_ref, o_ref, *, n):
    xr = x_ref[...].astype(jnp.float32)
    rows, cols = x_ref.shape
    total = rows * cols
    if total != n:  # static: input was zero-padded -> mask pad out of the stats
        flat = (jax.lax.broadcasted_iota(jnp.int32, (rows, cols), 0) * cols
                + jax.lax.broadcasted_iota(jnp.int32, (rows, cols), 1))
        mask = flat < n
        xm = jnp.where(mask, xr, 0.0)
    else:
        xm = xr
    n_f = jnp.float32(n)
    mean = jnp.sum(xm) / n_f
    d = xr - mean
    dsq = d * d
    if total != n:
        dsq = jnp.where(mask, dsq, 0.0)
    var = jnp.sum(dsq) / (n_f - 1.0)           # unbiased, like torch.std()
    inv = 1.0 / (jnp.sqrt(var) + _EPS)
    o_ref[...] = d * inv


# ---------------------------------------------------------------------------
# Pass 1 (tiled path): streaming stats with narrow accumulators.
# Grid = (n_splits, tiles_per_split); split axis is "parallel" (both TCs on
# v7x), tile axis is "arbitrary" (accumulation).  Emits per-split mean / M2.
# ---------------------------------------------------------------------------
def _stats_kernel(x_ref, mean_ref, m2_ref, acc_sum, acc_sq, shift_sm, *,
                  acc_cols, n_splits, n_full_split, n_last_split, use_shift):
    c = pl.program_id(0)
    i = pl.program_id(1)
    last_i = pl.num_programs(1) - 1
    _, rows, tile_cols = x_ref.shape

    @pl.when(i == 0)
    def _():
        acc_sum[...] = jnp.zeros_like(acc_sum)
        acc_sq[...] = jnp.zeros_like(acc_sq)
        if use_shift:
            shift_sm[0] = x_ref[0, 0, 0].astype(jnp.float32)

    if use_shift:
        k = shift_sm[0]
        # hoisted splat, reused by every chunk below
        kvec = jnp.broadcast_to(k, (rows, acc_cols)).astype(jnp.float32)
    else:
        k = jnp.float32(0.0)

    # Fold the tile in registers: 1 vld + ~4 VPU ops per data vreg, and the
    # two accumulators are read/written only ONCE per grid step.
    s = acc_sum[...]
    q = acc_sq[...]
    for ci in range(tile_cols // acc_cols):
        xb = x_ref[0, :, pl.ds(ci * acc_cols, acc_cols)].astype(jnp.float32)
        if use_shift:
            xb = xb - kvec
        s = s + xb
        q = q + xb * xb
    acc_sum[...] = s
    acc_sq[...] = q

    @pl.when(i == last_i)
    def _():
        ssum = jnp.sum(acc_sum[...])
        sqsum = jnp.sum(acc_sq[...])
        n_c = jnp.where(c == n_splits - 1,
                        jnp.float32(n_last_split), jnp.float32(n_full_split))
        mean_c = k + ssum / n_c
        m2_c = sqsum - ssum * ssum / n_c       # shift-invariant centered SSQ
        mean_ref[...] = jnp.broadcast_to(mean_c, mean_ref.shape)
        m2_ref[...] = jnp.broadcast_to(m2_c, m2_ref.shape)


# ---------------------------------------------------------------------------
# Pass 2 (tiled path): elementwise normalize; per-split partials via SMEM,
# combined with a Chan merge (cheap scalar prologue per grid step).
# ---------------------------------------------------------------------------
def _normalize_kernel(mean_ref, m2_ref, x_ref, o_ref, *, n, n_splits,
                      n_full_split, n_last_split):
    if n_splits == 1:
        mean = mean_ref[0, 0]
        m2 = m2_ref[0, 0]
    else:
        mu0 = mean_ref[0, 0]
        mu1 = mean_ref[8, 0]
        a0 = m2_ref[0, 0]
        a1 = m2_ref[8, 0]
        n0 = jnp.float32(n_full_split)
        n1 = jnp.float32(n_last_split)
        delta = mu1 - mu0
        mean = mu0 + delta * (n1 / (n0 + n1))
        m2 = a0 + a1 + delta * delta * (n0 * n1 / (n0 + n1))
    var = m2 / jnp.float32(n - 1)              # unbiased, like torch.std()
    std = jnp.sqrt(jnp.maximum(var, 0.0))
    inv = 1.0 / (std + _EPS)
    o_ref[...] = (x_ref[...].astype(jnp.float32) - mean) * inv


def _choose_tiling(n, rows, max_tile_cols):
    """Pick (tile_cols, num_tiles, n_padded_total) for the streaming path."""
    if n % rows == 0:
        cols = n // rows
        limit = min(max_tile_cols, cols)
        for k in range(limit // _LANE, 0, -1):
            cand = _LANE * k
            if cols % cand == 0:
                # accept a no-padding tiling as long as tiles stay big enough
                if cand * rows >= (1 << 16):      # >= 64K elems (256 KiB f32)
                    return cand, cols // cand, n
                break
    # Padded fallback: fixed large tiles, zero-pad the flat tail.
    # TODO(synk): a cdiv-grid with a masked last tile would avoid the
    #             pad / output-slice copies for ragged sizes.
    tile_cols = max_tile_cols
    num_tiles = pl.cdiv(n, rows * tile_cols)
    return tile_cols, num_tiles, num_tiles * rows * tile_cols


def normalize_audio(x, *, max_tile_cols=65536):
    """Pallas implementation of NormalizeAudio.forward (output is float32)."""
    x = jnp.asarray(x)
    if x.dtype not in (jnp.float32, jnp.bfloat16):
        x = x.astype(jnp.float32)
    orig_shape = x.shape
    n = int(x.size)
    if n == 0:
        return jnp.zeros(orig_shape, jnp.float32)

    rows = 16 if x.dtype == jnp.bfloat16 else 8   # bf16 vregs are (16, 128)
    fused_max_elems, fused_vmem = _fused_limits()

    # ------------- fused single-block path (1 HBM read + 1 write) -----------
    if n <= fused_max_elems:
        blk = rows * _LANE
        n_pad = pl.cdiv(n, blk) * blk
        x_flat = x.reshape(-1)
        if n_pad != n:
            x_flat = jnp.pad(x_flat, (0, n_pad - n))
        cols = n_pad // rows
        x2d = x_flat.reshape(rows, cols)
        out2d = pl.pallas_call(
            functools.partial(_fused_kernel, n=n),
            out_shape=jax.ShapeDtypeStruct((rows, cols), jnp.float32),
            grid=(1,),
            in_specs=[pl.BlockSpec((rows, cols), lambda i: (0, 0))],
            out_specs=pl.BlockSpec((rows, cols), lambda i: (0, 0)),
            compiler_params=pltpu.CompilerParams(
                dimension_semantics=("arbitrary",),
                vmem_limit_bytes=fused_vmem),
        )(x2d)
        out_flat = out2d.reshape(-1)
        if n_pad != n:
            out_flat = out_flat[:n]
        return out_flat.reshape(orig_shape)

    # ------------- tiled two-pass streaming path (large inputs) -------------
    tile_cols, num_tiles, n_pad = _choose_tiling(n, rows, max_tile_cols)
    x_flat = x.reshape(-1)
    if n_pad != n:
        x_flat = jnp.pad(x_flat, (0, n_pad - n))
    x3 = x_flat.reshape(num_tiles, rows, tile_cols)

    n_splits = 2 if (num_tiles % 2 == 0) else 1   # 2 -> both TCs on v7x
    tiles_per_split = num_tiles // n_splits
    elems_per_split = tiles_per_split * rows * tile_cols
    n_last_split = n - (n_splits - 1) * elems_per_split
    # Shifted (numerically stable) sums when there is no zero padding; with
    # padding we fall back to plain sums (zeros are then harmless).
    use_shift = (n_pad == n)

    acc_cols = 1024 if rows == 8 else 512
    acc_cols = min(acc_cols, tile_cols)

    mean_parts, m2_parts = pl.pallas_call(
        functools.partial(
            _stats_kernel, acc_cols=acc_cols, n_splits=n_splits,
            n_full_split=elems_per_split, n_last_split=n_last_split,
            use_shift=use_shift),
        out_shape=(jax.ShapeDtypeStruct((n_splits, 8, _LANE), jnp.float32),
                   jax.ShapeDtypeStruct((n_splits, 8, _LANE), jnp.float32)),
        grid=(n_splits, tiles_per_split),
        in_specs=[pl.BlockSpec(
            (1, rows, tile_cols),
            lambda c, i: (c * tiles_per_split + i, 0, 0))],
        out_specs=(pl.BlockSpec((1, 8, _LANE), lambda c, i: (c, 0, 0)),
                   pl.BlockSpec((1, 8, _LANE), lambda c, i: (c, 0, 0))),
        scratch_shapes=[pltpu.VMEM((rows, acc_cols), jnp.float32),
                        pltpu.VMEM((rows, acc_cols), jnp.float32),
                        pltpu.SMEM((1,), jnp.float32)],
        compiler_params=pltpu.CompilerParams(
            dimension_semantics=("parallel", "arbitrary"),
            vmem_limit_bytes=32 << 20),
    )(x3)

    out3 = pl.pallas_call(
        functools.partial(_normalize_kernel, n=n, n_splits=n_splits,
                          n_full_split=elems_per_split,
                          n_last_split=n_last_split),
        out_shape=jax.ShapeDtypeStruct((num_tiles, rows, tile_cols),
                                       jnp.float32),
        grid=(num_tiles,),
        in_specs=[
            pl.BlockSpec(memory_space=pltpu.MemorySpace.SMEM),  # per-split mean
            pl.BlockSpec(memory_space=pltpu.MemorySpace.SMEM),  # per-split M2
            pl.BlockSpec((1, rows, tile_cols), lambda i: (i, 0, 0)),
        ],
        out_specs=pl.BlockSpec((1, rows, tile_cols), lambda i: (i, 0, 0)),
        compiler_params=pltpu.CompilerParams(
            dimension_semantics=("parallel",),
            vmem_limit_bytes=32 << 20),
    )(mean_parts.reshape(n_splits * 8, _LANE),
      m2_parts.reshape(n_splits * 8, _LANE),
      x3)

    out_flat = out3.reshape(-1)
    if n_pad != n:
        out_flat = out_flat[:n]
    return out_flat.reshape(orig_shape)


if __name__ == "__main__":
    key = jax.random.PRNGKey(0)

    # Small NCHW-ish input (2,4,16,16) -> fused single-block path.
    x = jax.random.normal(key, (2, 4, 16, 16), dtype=jnp.float32) * 3.0 + 1.5
    out = jax.block_until_ready(normalize_audio(x))
    xf = x.astype(jnp.float32)
    ref = (xf - jnp.mean(xf)) / (jnp.std(xf, ddof=1) + 1e-8)
    assert out.shape == x.shape and out.dtype == jnp.float32
    err = float(jnp.max(jnp.abs(out - ref)))
    assert err < 1e-4, f"fused path mismatch vs reference: {err}"

    # Ragged tiny input -> fused path with in-kernel pad masking.
    x_odd = (jax.random.normal(jax.random.PRNGKey(1), (3, 5, 7),
                               dtype=jnp.float32) * 0.7 - 2.0)
    out_odd = jax.block_until_ready(normalize_audio(x_odd))
    ref_odd = (x_odd - jnp.mean(x_odd)) / (jnp.std(x_odd, ddof=1) + 1e-8)
    err_odd = float(jnp.max(jnp.abs(out_odd - ref_odd)))
    assert out_odd.shape == x_odd.shape and out_odd.dtype == jnp.float32
    assert err_odd < 1e-4, f"masked fused path mismatch vs reference: {err_odd}"

    # Larger input -> tiled streaming path (2-split stats + parallel normalize).
    x_big = (jax.random.normal(jax.random.PRNGKey(2), (8, 1024, 640),
                               dtype=jnp.float32) * 2.0 + 1.5)
    out_big = jax.block_until_ready(normalize_audio(x_big))
    ref_big = (x_big - jnp.mean(x_big)) / (jnp.std(x_big, ddof=1) + 1e-8)
    err_big = float(jnp.max(jnp.abs(out_big - ref_big)))
    assert out_big.shape == x_big.shape and out_big.dtype == jnp.float32
    assert err_big < 1e-3, f"tiled path mismatch vs reference: {err_big}"

    print("KERNEL_OK")
</pallas_src>

<mosaic_0001>
module attributes {stable_mosaic.version = 11 : i64} {
  func.func @_fused_kernel(%arg0: i32, %arg1: memref<8x256xf32, #tpu.memory_space<vmem>>, %arg2: memref<8x256xf32, #tpu.memory_space<vmem>>) attributes {dimension_semantics = [#tpu.dimension_semantics<arbitrary>], iteration_bounds = array<i64: 1>, scalar_prefetch = 0 : i64, scratch_operands = 0 : i64, tpu.core_type = #tpu.core_type<tc>, window_params = [{pipeline_mode = #tpu.pipeline_mode<synchronous>, transform_indices = @transform_0, window_bounds = array<i64: 8, 256>}, {pipeline_mode = #tpu.pipeline_mode<synchronous>, transform_indices = @transform_1, window_bounds = array<i64: 8, 256>}]} {
    %c0 = arith.constant 0 : index
    %c0_0 = arith.constant 0 : index
    %0 = vector.load %arg1[%c0, %c0_0] : memref<8x256xf32, #tpu.memory_space<vmem>>, vector<8x256xf32>
    %1 = vector.shape_cast %0 : vector<8x256xf32> to vector<1x8x256xf32>
    %cst = arith.constant dense<0.000000e+00> : vector<1xf32>
    %2 = vector.multi_reduction <add>, %1, %cst [1, 2] : vector<1x8x256xf32> to vector<1xf32>
    %3 = vector.shape_cast %2 : vector<1xf32> to vector<1x1x1xf32>
    %4 = vector.extract %3[0, 0, 0] : f32 from vector<1x1x1xf32>
    %cst_1 = arith.constant 2.048000e+03 : f32
    %5 = arith.divf %4, %cst_1 : f32
    %6 = vector.broadcast %5 : f32 to vector<8x256xf32>
    %7 = arith.subf %0, %6 : vector<8x256xf32>
    %8 = arith.mulf %7, %7 : vector<8x256xf32>
    %9 = vector.shape_cast %8 : vector<8x256xf32> to vector<1x8x256xf32>
    %cst_2 = arith.constant dense<0.000000e+00> : vector<1xf32>
    %10 = vector.multi_reduction <add>, %9, %cst_2 [1, 2] : vector<1x8x256xf32> to vector<1xf32>
    %11 = vector.shape_cast %10 : vector<1xf32> to vector<1x1x1xf32>
    %12 = vector.extract %11[0, 0, 0] : f32 from vector<1x1x1xf32>
    %cst_3 = arith.constant 2.048000e+03 : f32
    %cst_4 = arith.constant 1.000000e+00 : f32
    %13 = arith.subf %cst_3, %cst_4 : f32
    %14 = arith.divf %12, %13 : f32
    %15 = math.sqrt %14 : f32
    %cst_5 = arith.constant 9.99999993E-9 : f32
    %16 = arith.addf %15, %cst_5 : f32
    %cst_6 = arith.constant 1.000000e+00 : f32
    %17 = arith.divf %cst_6, %16 : f32
    %18 = vector.broadcast %17 : f32 to vector<8x256xf32>
    %19 = arith.mulf %7, %18 : vector<8x256xf32>
    %c0_7 = arith.constant 0 : index
    %c0_8 = arith.constant 0 : index
    %20 = vector.load %arg2[%c0_7, %c0_8] : memref<8x256xf32, #tpu.memory_space<vmem>>, vector<8x256xf32>
    tpu.vector_store %arg2[%c0_7, %c0_8], %19 {strides = array<i32>} : memref<8x256xf32, #tpu.memory_space<vmem>>, vector<8x256xf32>,
    return
  }
  func.func @transform_0(%arg0: i32) -> (i32, i32) {
    %c0_i32 = arith.constant 0 : i32
    %c0_i32_0 = arith.constant 0 : i32
    %c0_i32_1 = arith.constant 0 : i32
    return %c0_i32, %c0_i32_0 : i32, i32
  }
  func.func @transform_1(%arg0: i32) -> (i32, i32) {
    %c0_i32 = arith.constant 0 : i32
    %c0_i32_0 = arith.constant 0 : i32
    %c0_i32_1 = arith.constant 0 : i32
    return %c0_i32, %c0_i32_0 : i32, i32
  }
}

</mosaic_0001>

<bundles_post_ra>
// kernel: tpu_custom_call.1
= control target key start
LH: loop header
LB: loop body
LE: loop exit
PB: predicated region body
PF: predicated region fallthrough
CT: control target
= control target key end

     0   :  { %6 = vsyncpa [#allocation3], 0  ;;  %s185_s0 = inlined_call_operand.hbm [shape: f32[8,256], index: 0, kind: input, shape index: {}]   ;;  %s186_s1 = inlined_call_operand.hbm [shape: f32[8,256], index: 1, kind: output, shape index: {}]  }
   0x1   :  { %7 = vsyncpa [#allocation4], 0  ;;  %s149_s6 = smov [#allocation2]   ;;  %s101_s10 = scalar_lea.hbm %s185_s0, 256 }
   0x2   :  { %s14_s7 = sshll.u32 %s149_s6, 4  ;;  %p102_p0 = scmp.ne.s32.totalorder %s185_s0, %s101_s10  ;;  %s15_s7 = int_to_ptr.vmem [resolvable:$true] %s14_s7 }
   0x3   :  { %p105_p1 = scmp.lt.u32.totalorder %s101_s10, %s185_s0 }
   0x5   :  { %p107_p2 = pnand %p105_p1, %p102_p0 }
   0x7   :  { %110 = shalt.err (!%p107_p2)
}
   0x8   :  { %s111_s15 = scalar_lea.vmem %s15_s7, 256  ;;  %p116_p4 = scmp.lt.s32.totalorder %s15_s7, %s15_s7 }
   0x9   :  { %p112_p3 = scmp.ne.s32.totalorder %s15_s7, %s111_s15  ;;  %p117_p5 = scmp.lt.s32.totalorder %s111_s15, %s111_s15 }
   0xb   :  { %p118_p6 = por %p117_p5, %p116_p4 }
   0xd   :  { %p119_p7 = pnand %p118_p6, %p112_p3 }
   0xf   :  { %122 = shalt.err (!%p119_p7)
}
  0x10   :  { %17 = dma.hbm_to_vmem [thread:$0]  %s185_s0, 256, %s15_s7, [#allocation3]  }
  0x11   :  { %145 = dma.done.wait [#allocation3], 256  }
  0x12   :  { %146 = vsyncadd [#allocation3], 4294967040  ;;  %v21_v0 = vld [vmem:[#allocation2] sm:$0xff]  ;;  %v22_v1 = vld [vmem:[#allocation2 + $0x8] sm:$0xff]  ;;  %s150_s23 = smov [#allocation5]  }
  0x13   :  { %v23_v2 = vadd.f32 %v22_v1, %v21_v0  ;;  %s78_s24 = sshll.u32 %s150_s23, 4  ;;  %s79_s24 = int_to_ptr.vmem [resolvable:$true] %s78_s24 }
  0x14   :  { %s123_s26 = scalar_lea.vmem %s79_s24, 256  ;;  %p128_p9 = scmp.lt.s32.totalorder %s79_s24, %s79_s24 }
  0x15   :  { %24 = vadd.xlane.f32.xlu0 %v23_v2  ;;  %p124_p8 = scmp.ne.s32.totalorder %s79_s24, %s123_s26  ;;  %p129_p10 = scmp.lt.s32.totalorder %s123_s26, %s123_s26 }
  0x17   :  { %p130_p11 = por %p129_p10, %p128_p9 }
  0x19   :  { %p131_p12 = pnand %p130_p11, %p124_p8 }
  0xa2   :  { %v25_v3 = vpop.xlane.xlu0 %24 }
  0xa3   :  { %v26_v4 = vrot.slane %v25_v3, 4 }
  0xa5   :  { %v27_v5 = vadd.f32 %v26_v4, %v25_v3 }
  0xa7   :  { %v28_v6 = vrot.slane %v27_v5, 2 }
  0xa9   :  { %v29_v7 = vadd.f32 %v28_v6, %v27_v5 }
  0xab   :  { %v30_v8 = vrot.slane %v29_v7, 1 }
  0xad   :  { %v31_v9 = vadd.f32 %v30_v8, %v29_v7 }
  0xaf   :  { %87 = vpush %v31_v9 }
  0xe0   :  { %s88_s18 = spop %87 }
  0xe1   :  { %s35_s19 = smul.f32 0.00048828125, %s88_s18 }
  0xe3   :  { %v36_v10 = vstv %s35_s19 }
  0xe4   :  { %v37_v11 = vsub.f32 %v21_v0, %v36_v10  ;;  %v38_v12 = vsub.f32 %v22_v1, %v36_v10 }
  0xe6   :  { %v39_v13 = vmul.f32 %v37_v11, %v37_v11  ;;  %v40_v14 = vmul.f32 %v38_v12, %v38_v12 }
  0xe8   :  { %v41_v15 = vadd.f32 %v40_v14, %v39_v13 }
  0xea   :  { %42 = vadd.xlane.f32.xlu0 %v41_v15 }
 0x177   :  { %v43_v16 = vpop.xlane.xlu0 %42 }
 0x178   :  { %v44_v17 = vrot.slane %v43_v16, 4 }
 0x17a   :  { %v45_v18 = vadd.f32 %v44_v17, %v43_v16 }
 0x17c   :  { %v46_v19 = vrot.slane %v45_v18, 2 }
 0x17e   :  { %v47_v20 = vadd.f32 %v46_v19, %v45_v18 }
 0x180   :  { %v48_v21 = vrot.slane %v47_v20, 1 }
 0x182   :  { %v49_v22 = vadd.f32 %v48_v21, %v47_v20 }
 0x184   :  { %89 = vpush %v49_v22 }
 0x1b5   :  { %s90_s0 = spop %89 }
 0x1b6   :  { %s53_s20 = smul.f32 0.0004885198, %s90_s0 }
 0x1b8   :  { %v54_v23 = vstv %s53_s20 }
 0x1b9   :  { %97 = vrsqrt.f32 %v54_v23  ;;  %vm57_vm0 = vcmp.eq.f32.partialorder %v54_v23, inf  ;;  %v60_v26 = vand.u32 2147483648, %v54_v23  ;;  %vm59_vm1 = vcmp.eq.f32.partialorder %v54_v23, 0.0 }
 0x1c3   :  { %v98_v24 = vpop.eup %97 }
 0x1c4   :  { %v56_v25 = vmul.f32 %v98_v24, %v54_v23 }
 0x1c6   :  { %v58_v27 = vsel %vm57_vm0, %v54_v23, %v56_v25 }
 0x1c7   :  { %v61_v28 = vsel %vm59_vm1, %v60_v26, %v58_v27 }
 0x1c8   :  { %91 = vpush %v61_v28 }
 0x1f9   :  { %s92_s21 = spop %91 }
 0x1fa   :  { %s63_s22 = sadd.f32 1e-08, %s92_s21 }
 0x1fc   :  { %v64_v29 = vstv %s63_s22 }
 0x1fd   :  { %99 = vrcp.f32 %v64_v29 }
 0x207   :  { %v100_v30 = vpop.eup %99 }
 0x208   :  { %93 = vpush %v100_v30 }
 0x239   :  { %s94_s25 = spop %93 }
 0x23a   :  { %v67_v31 = vstv %s94_s25 }
 0x23b   :  { %v68_v32 = vmul.f32 %v67_v31, %v37_v11  ;;  %v69_v33 = vmul.f32 %v67_v31, %v38_v12 }
 0x23d   :  { %70 = vst [vmem:[#allocation5] sm:$0xff] %v68_v32  ;;  %71 = vst [vmem:[#allocation5 + $0x8] sm:$0xff] %v69_v33 }
 0x23e   :  { %134 = shalt.err (!%p131_p12)
}
 0x23f   :  { %s135_s29 = scalar_lea.hbm %s186_s1, 256 }
 0x240   :  { %p136_p13 = scmp.ne.s32.totalorder %s186_s1, %s135_s29  ;;  %p139_p0 = scmp.lt.u32.totalorder %s135_s29, %s186_s1 }
 0x242   :  { %p141_p1 = pnand %p139_p0, %p136_p13 }
 0x244   :  { %144 = shalt.err (!%p141_p1)
}
 0x245   :  { %81 = dma.vmem_to_hbm [thread:$0]  %s79_s24, 256, %s186_s1, [#allocation4]  }
 0x246   :  { %147 = dma.done.wait [#allocation4], 256  }
 0x247   :  { %148 = vsyncadd [#allocation4], 4294967040 }
 0x248   :  { %85 = vsyncpa [#allocation3], 1 }
 0x249   :  { %86 = vsyncpa [#allocation4], 1 }

</bundles_post_ra>
